<compile_context>
chip_gen: v5e
topology: v5e:2x2
jax: 0.10.0
libtpu: 0.0.40
codegen_flags: <defaults>
</compile_context>

<pallas_src>
import functools

import jax
import jax.numpy as jnp
from jax import lax
from jax.experimental import pallas as pl
from jax.experimental.pallas import tpu as pltpu


# ----------------------------------------------------------------------------
# helpers
# ----------------------------------------------------------------------------
def _round_up(x, m):
    return ((x + m - 1) // m) * m


def _cdiv(a, b):
    return -(-a // b)


# Per-call VMEM tile footprint cap: fits v5e's 16 MiB / v6e+v7x's 32 MiB
# default scoped limits with headroom (we also pass vmem_limit_bytes below).
_VMEM_TILE_BUDGET = 12 * 1024 * 1024


def _pick_tk(K, tk_max=2048):
    # Never round K up to a multiple of tk_max (perf review #1): pick the
    # number of K steps first, then the per-step tile -> Kp == round_up(K,128).
    nk = _cdiv(K, tk_max)
    return _round_up(_cdiv(K, nk), 128)


def _gemm_vmem_bytes(TM, TK, TN):
    # Double-buffered bf16 A / W / out blocks + f32 accumulator + bias,
    # accounting for internal lane padding of narrow (TN < 128) blocks.
    lanes = max(TN, 128)
    a = 2 * TM * TK * 2
    w = 2 * TK * lanes * 2
    o = 2 * TM * lanes * 2
    acc = TM * lanes * 4
    bias = 2 * 8 * lanes * 4
    return a + w + o + acc + bias


def _pick_tiles(M, K, N):
    TK = _pick_tk(K)
    if N >= 512:
        TN = 256
    elif N >= 128:
        TN = 128
    elif N >= 32:
        # Full-width narrow block: no padded weight DMA / output writeback and
        # no post-call [:, :N] slice for the iconv/uconv layers (review #5).
        TN = N
    else:
        # Extremely narrow packed udisp GEMMs (N=4): keep a lane-dense block;
        # the padded weight is only a few KiB.
        TN = 128
    # Grow TM for the large-M high-resolution GEMMs so each grid step
    # amortizes the ~0.35us per-step pipeline overhead (review #3), subject to
    # the VMEM tile budget (review v5e/v7x item).
    TM = None
    for cand in (1024, 512, 256):
        if M >= cand and _gemm_vmem_bytes(cand, TK, TN) <= _VMEM_TILE_BUDGET:
            TM = cand
            break
    if TM is None:
        TM = _round_up(max(M, 16), 16)   # bf16 sublane granularity
    return TM, TK, TN


def _vmem_limit(tile_bytes):
    return int(min(max(2 * tile_bytes, 16 * 1024 * 1024), 32 * 1024 * 1024))


def _norm_pad(pad):
    if isinstance(pad, int):
        return (pad, pad, pad, pad)
    return pad


# ----------------------------------------------------------------------------
# Pallas kernel 1: C = relu?(A @ W + b), bf16 operands, f32 accumulator.
# ----------------------------------------------------------------------------
def _gemm_bias_kernel(a_ref, w_ref, b_ref, o_ref, acc_ref, *, relu):
    k = pl.program_id(2)

    @pl.when(k == 0)
    def _():
        acc_ref[...] = jnp.zeros_like(acc_ref)

    acc_ref[...] += jnp.dot(a_ref[...], w_ref[...],
                            preferred_element_type=jnp.float32)

    @pl.when(k == pl.num_programs(2) - 1)
    def _():
        out = acc_ref[...] + b_ref[...]
        if relu:
            out = jnp.maximum(out, 0.0)
        o_ref[...] = out.astype(o_ref.dtype)


def matmul_bias(a, w, b, relu, out_dtype=jnp.bfloat16):
    """a: (M, K), w: (K, N), b: (N,) -> (M, N); bf16 MXU GEMM, f32 accum."""
    M, K = a.shape
    _, N = w.shape
    TM, TK, TN = _pick_tiles(M, K, N)
    Mp, Kp, Np = _round_up(M, TM), _round_up(K, TK), _round_up(N, TN)

    a_p = jnp.pad(a.astype(jnp.bfloat16), ((0, Mp - M), (0, Kp - K)))
    w_p = jnp.pad(w.astype(jnp.bfloat16), ((0, Kp - K), (0, Np - N)))
    b_p = jnp.pad(b.astype(jnp.float32).reshape(1, N), ((0, 0), (0, Np - N)))

    out = pl.pallas_call(
        functools.partial(_gemm_bias_kernel, relu=relu),
        out_shape=jax.ShapeDtypeStruct((Mp, Np), out_dtype),
        grid_spec=pltpu.PrefetchScalarGridSpec(
            num_scalar_prefetch=0,
            grid=(Mp // TM, Np // TN, Kp // TK),
            in_specs=[
                pl.BlockSpec((TM, TK), lambda i, j, k: (i, k)),
                # TODO(synk): pipeline_mode=pl.Buffered(3) here for v5e's
                # multi-K-step weight stream.
                pl.BlockSpec((TK, TN), lambda i, j, k: (k, j)),
                pl.BlockSpec((1, TN), lambda i, j, k: (0, j)),
            ],
            out_specs=pl.BlockSpec((TM, TN), lambda i, j, k: (i, j)),
            scratch_shapes=[pltpu.VMEM((TM, TN), jnp.float32)],
        ),
        compiler_params=pltpu.CompilerParams(
            dimension_semantics=("parallel", "parallel", "arbitrary"),
            vmem_limit_bytes=_vmem_limit(_gemm_vmem_bytes(TM, TK, TN))),
    )(a_p, w_p, b_p)
    if Mp == M and Np == N:
        return out
    return out[:M, :N]


# ----------------------------------------------------------------------------
# Pallas kernel 2: Cout==1 disparity heads -- (M, K) x (K,) + b.
# Per-lane f32 partial sums in the K loop (VALU only); single XLU cross-lane
# reduction + bias in the last-K epilogue.  Keeps the MXU / padded-N path off
# the tiny heads entirely.
# ----------------------------------------------------------------------------
def _matvec_bias_kernel(a_ref, w_ref, b_ref, o_ref, acc_ref):
    k = pl.program_id(1)

    @pl.when(k == 0)
    def _():
        acc_ref[...] = jnp.zeros_like(acc_ref)

    prod = a_ref[...].astype(jnp.float32) * w_ref[...].astype(jnp.float32)
    tk = prod.shape[1]
    part = prod[:, 0:128]
    for g in range(1, tk // 128):                 # lane-aligned static slices
        part = part + prod[:, g * 128:(g + 1) * 128]
    acc_ref[...] += part

    @pl.when(k == pl.num_programs(1) - 1)
    def _():
        o_ref[...] = (jnp.sum(acc_ref[...], axis=1, keepdims=True)
                      + b_ref[...]).astype(o_ref.dtype)


def matvec_bias(a, w, b):
    """a: (M, K), w: (K,), b: (1,) -> (M, 1) float32."""
    M, K = a.shape
    TK = _pick_tk(K)
    TM = None
    for cand in (1024, 512, 256):
        vmem = 2 * cand * TK * 2 + cand * 128 * 4 + 2 * cand * 128 * 4 + 2 * TK * 4
        if M >= cand and vmem <= _VMEM_TILE_BUDGET:
            TM = cand
            break
    if TM is None:
        TM = _round_up(max(M, 16), 16)
    Mp, Kp = _round_up(M, TM), _round_up(K, TK)

    a_p = jnp.pad(a.astype(jnp.bfloat16), ((0, Mp - M), (0, Kp - K)))
    w_p = jnp.pad(w.astype(jnp.float32).reshape(1, K), ((0, 0), (0, Kp - K)))
    b_p = b.astype(jnp.float32).reshape(1, 1)

    vmem = 2 * TM * TK * 2 + TM * 128 * 4 + 2 * TM * 128 * 4 + 2 * TK * 4
    out = pl.pallas_call(
        _matvec_bias_kernel,
        out_shape=jax.ShapeDtypeStruct((Mp, 1), jnp.float32),
        grid_spec=pltpu.PrefetchScalarGridSpec(
            num_scalar_prefetch=0,
            grid=(Mp // TM, Kp // TK),
            in_specs=[
                pl.BlockSpec((TM, TK), lambda i, k: (i, k)),
                pl.BlockSpec((1, TK), lambda i, k: (0, k)),
                pl.BlockSpec((1, 1), lambda i, k: (0, 0)),
            ],
            out_specs=pl.BlockSpec((TM, 1), lambda i, k: (i, 0)),
            scratch_shapes=[pltpu.VMEM((TM, 128), jnp.float32)],
        ),
        compiler_params=pltpu.CompilerParams(
            dimension_semantics=("parallel", "arbitrary"),
            vmem_limit_bytes=_vmem_limit(vmem)),
    )(a_p, w_p, b_p)
    return out[:M, :]


# ----------------------------------------------------------------------------
# Conv / transposed-conv glue (im2col is pure padding + strided slicing).
# TODO(synk): fuse the tap shifts into the kernel DMA pipeline so the 3x3
# layers stop writing/re-reading ~9x the activation bytes through HBM.
# ----------------------------------------------------------------------------
def conv2d_nhwc(x, w, b, stride, pad, relu, out_dtype=jnp.bfloat16):
    """x: (N,H,W,Cin) NHWC; w: (Cout,Cin,kh,kw) PyTorch layout; b: (Cout,)."""
    Cout, Cin, kh, kw = w.shape
    N, H, W, _ = x.shape
    pt, pb, pleft, pright = _norm_pad(pad)
    xp = jnp.pad(x.astype(jnp.bfloat16),
                 ((0, 0), (pt, pb), (pleft, pright), (0, 0)))
    Ho = (H + pt + pb - kh) // stride + 1
    Wo = (W + pleft + pright - kw) // stride + 1

    cols = []
    for ky in range(kh):
        for kx in range(kw):
            cols.append(xp[:, ky:ky + stride * (Ho - 1) + 1:stride,
                           kx:kx + stride * (Wo - 1) + 1:stride, :])
    patches = jnp.concatenate(cols, axis=-1).reshape(N * Ho * Wo, kh * kw * Cin)

    # match the [ky, kx, Cin] ordering of the patch columns
    wm = jnp.transpose(w, (2, 3, 1, 0)).reshape(kh * kw * Cin, Cout)

    if Cout == 1 and not relu:
        out = matvec_bias(patches, wm[:, 0], b)           # disparity-head path
        return out.reshape(N, Ho, Wo, 1)
    out = matmul_bias(patches, wm, b, relu, out_dtype)
    return out.reshape(N, Ho, Wo, Cout)


def conv_transpose2d_nhwc(x, w, b, relu, out_dtype=jnp.bfloat16):
    """PyTorch ConvTranspose2d(kernel=4, stride=2, padding=1).

    Sub-pixel (phase) decomposition: each output parity class (r, s) is an
    ordinary stride-1 2x2 conv with a sub-kernel of w, packed into a single
    GEMM -> no zero-dilated tensor and no MXU work on inserted zeros.
      out[2a+r, 2b+s, co] = sum_{p,q,ci} xpad[a+r+p, b+s+q, ci]
                                          * w[ci, co, 3-r-2p, 3-s-2q] + b[co]
    """
    Cin, Cout, kh, kw = w.shape
    assert kh == 4 and kw == 4
    N, H, W, _ = x.shape

    xp = jnp.pad(x.astype(jnp.bfloat16), ((0, 0), (1, 1), (1, 1), (0, 0)))
    cols = []
    for p in range(2):
        for q in range(2):
            cols.append(xp[:, p:p + H + 1, q:q + W + 1, :])
    patches = jnp.concatenate(cols, axis=-1).reshape(
        N * (H + 1) * (W + 1), 4 * Cin)

    tap = jnp.array([[3, 1], [2, 0]], dtype=jnp.int32)           # tap[r, p]
    w_hw = jnp.transpose(w, (2, 3, 0, 1))                        # (ky,kx,Cin,Cout)
    w_sub = w_hw[tap[:, :, None, None], tap[None, None, :, :]]   # (r,p,s,q,Ci,Co)
    wm = jnp.transpose(w_sub, (1, 3, 4, 0, 2, 5)).reshape(4 * Cin, 4 * Cout)
    bm = jnp.tile(b.astype(jnp.float32), 4)

    big = matmul_bias(patches, wm, bm, relu, out_dtype)
    big = big.reshape(N, H + 1, W + 1, 4, Cout)

    # TODO(synk): fold this phase de-interleave into the consumer layer.
    ph = [[big[:, r:r + H, s:s + W, 2 * r + s, :] for s in range(2)]
          for r in range(2)]
    rows = [jnp.stack(ph[r], axis=3) for r in range(2)]          # (N,H,W,2,Co)
    out = jnp.stack(rows, axis=2)                                # (N,H,2,W,2,Co)
    return out.reshape(N, 2 * H, 2 * W, Cout)


# ----------------------------------------------------------------------------
# Deterministic parameter construction (synthetic weights).
# ----------------------------------------------------------------------------
_CONV_SPECS = [
    ("conv_redir", 128, 64, 1),
    ("conv3_1a", 145, 256, 3), ("conv3_1b", 256, 256, 3),
    ("conv4_1a", 256, 512, 3), ("conv4_1b", 512, 512, 3),
    ("conv5_1a", 512, 512, 3), ("conv5_1b", 512, 512, 3),
    ("conv6_1a", 512, 1024, 3), ("conv6_1b", 1024, 1024, 3),
    ("disp6", 1024, 1, 3),
    ("iconv5", 1025, 512, 3), ("disp5", 512, 1, 3),
    ("iconv4", 769, 256, 3), ("disp4", 256, 1, 3),
    ("iconv3", 385, 128, 3), ("disp3", 128, 1, 3),
    ("iconv2", 193, 64, 3), ("disp2", 64, 1, 3),
    ("iconv1", 97, 32, 3), ("disp1", 32, 1, 3),
    ("iconv0", 65, 32, 3), ("disp0", 32, 1, 3),
]
_DECONV_SPECS = [
    ("udisp6", 1, 1, 4), ("uconv5", 1024, 512, 4),
    ("udisp5", 1, 1, 4), ("uconv4", 512, 256, 4),
    ("udisp4", 1, 1, 4), ("uconv3", 256, 128, 4),
    ("udisp3", 1, 1, 4), ("uconv2", 128, 64, 4),
    ("udisp2", 1, 1, 4), ("uconv1", 64, 32, 4),
    ("udisp1", 1, 1, 4), ("uconv0", 32, 32, 4),
]


def make_params(key):
    params = {}
    for name, cin, cout, k in _CONV_SPECS:
        key, k1, k2 = jax.random.split(key, 3)
        scale = 1.0 / (cin * k * k) ** 0.5
        params[name] = (
            jax.random.normal(k1, (cout, cin, k, k), jnp.float32) * scale,
            jax.random.normal(k2, (cout,), jnp.float32) * scale,
        )
    for name, cin, cout, k in _DECONV_SPECS:
        key, k1, k2 = jax.random.split(key, 3)
        scale = 1.0 / (cin * k * k) ** 0.5
        params[name] = (
            jax.random.normal(k1, (cin, cout, k, k), jnp.float32) * scale,
            jax.random.normal(k2, (cout,), jnp.float32) * scale,
        )
    return params


# ----------------------------------------------------------------------------
# Forward pass (mirrors disparity_estimation.forward)
# ----------------------------------------------------------------------------
def forward_nhwc(p, conv1a, up_1a2a, conv2a, corr1d):
    bf = jnp.bfloat16
    conv1a, up_1a2a, conv2a, corr1d = (
        t.astype(bf) for t in (conv1a, up_1a2a, conv2a, corr1d))

    def c(x, name, stride, pad, relu):
        return conv2d_nhwc(x, p[name][0], p[name][1], stride, pad, relu)

    def d(x, name, relu):
        return conv_transpose2d_nhwc(x, p[name][0], p[name][1], relu)

    conv_redir = c(conv2a, "conv_redir", 1, 0, True)
    corr_redir = jnp.concatenate([corr1d, conv_redir], axis=-1)
    conv3_1 = c(c(corr_redir, "conv3_1a", 2, 1, True), "conv3_1b", 1, 1, True)
    conv4_1 = c(c(conv3_1, "conv4_1a", 2, 1, True), "conv4_1b", 1, 1, True)
    conv5_1 = c(c(conv4_1, "conv5_1a", 2, 1, True), "conv5_1b", 1, 1, True)
    conv6_1 = c(c(conv5_1, "conv6_1a", 2, 1, True), "conv6_1b", 1, 1, True)

    disp6 = c(conv6_1, "disp6", 1, 1, False)
    udisp6 = d(disp6, "udisp6", False)
    uconv5 = d(conv6_1, "uconv5", True)
    iconv5 = c(jnp.concatenate([uconv5, udisp6, conv5_1], -1), "iconv5", 1, 1, True)

    disp5 = c(iconv5, "disp5", 1, 1, False)
    udisp5 = d(disp5, "udisp5", False)
    uconv4 = d(iconv5, "uconv4", True)
    iconv4 = c(jnp.concatenate([uconv4, udisp5, conv4_1], -1), "iconv4", 1, 1, True)

    disp4 = c(iconv4, "disp4", 1, 1, False)
    udisp4 = d(disp4, "udisp4", False)
    uconv3 = d(iconv4, "uconv3", True)
    iconv3 = c(jnp.concatenate([uconv3, udisp4, conv3_1], -1), "iconv3", 1, 1, True)

    disp3 = c(iconv3, "disp3", 1, 1, False)
    udisp3 = d(disp3, "udisp3", False)
    uconv2 = d(iconv3, "uconv2", True)
    iconv2 = c(jnp.concatenate([uconv2, udisp3, conv2a], -1), "iconv2", 1, 1, True)

    disp2 = c(iconv2, "disp2", 1, 1, False)
    udisp2 = d(disp2, "udisp2", False)
    uconv1 = d(iconv2, "uconv1", True)
    iconv1 = c(jnp.concatenate([uconv1, udisp2, conv1a], -1), "iconv1", 1, 1, True)

    disp1 = c(iconv1, "disp1", 1, 1, False)
    udisp1 = d(disp1, "udisp1", False)
    uconv0 = d(iconv1, "uconv0", True)
    iconv0 = c(jnp.concatenate([uconv0, udisp1, up_1a2a], -1), "iconv0", 1, 1, True)

    disp0 = c(iconv0, "disp0", 1, 1, False)
    return disp0, disp1, disp2, disp3, disp4, disp5, disp6


@jax.jit
def forward_nchw(params, conv1a, up_1a2a, conv2a, corr1d):
    to_nhwc = lambda t: jnp.transpose(t, (0, 2, 3, 1))
    outs = forward_nhwc(params, to_nhwc(conv1a), to_nhwc(up_1a2a),
                        to_nhwc(conv2a), to_nhwc(corr1d))
    return tuple(jnp.transpose(o, (0, 3, 1, 2)) for o in outs)


# ----------------------------------------------------------------------------
# Self-check of the Pallas conv / deconv paths against lax references.
# ----------------------------------------------------------------------------
def _ref_conv2d(x, w, b, stride, pad, relu):
    pt, pb, pleft, pright = _norm_pad(pad)
    out = lax.conv_general_dilated(
        x, jnp.transpose(w, (2, 3, 1, 0)), (stride, stride),
        ((pt, pb), (pleft, pright)),
        dimension_numbers=("NHWC", "HWIO", "NHWC"))
    out = out + b
    return jnp.maximum(out, 0.0) if relu else out


def _ref_deconv(x, w, b, relu):
    wf = jnp.transpose(w[:, :, ::-1, ::-1], (2, 3, 0, 1))
    out = lax.conv_general_dilated(
        x, wf, (1, 1), ((2, 2), (2, 2)), lhs_dilation=(2, 2),
        dimension_numbers=("NHWC", "HWIO", "NHWC"))
    out = out + b
    return jnp.maximum(out, 0.0) if relu else out


def _self_check(key):
    def bf(t):
        return t.astype(jnp.bfloat16).astype(jnp.float32)

    def close(got, ref, name):
        got = got.astype(jnp.float32)
        err = float(jnp.max(jnp.abs(got - ref)))
        tol = 5e-2 * max(1.0, float(jnp.max(jnp.abs(ref))))
        assert err <= tol, (name, err, tol)

    ks = jax.random.split(key, 8)
    x = jax.random.normal(ks[0], (2, 8, 8, 16), jnp.float32)
    # Cout=32 exercises the non-padded narrow-N (TN == N) GEMM path.
    w = jax.random.normal(ks[1], (32, 16, 3, 3), jnp.float32) * 0.1
    b = jax.random.normal(ks[2], (32,), jnp.float32) * 0.1
    close(conv2d_nhwc(x, w, b, 1, 1, True, jnp.float32),
          _ref_conv2d(bf(x), bf(w), b, 1, 1, True), "conv3x3_s1")
    close(conv2d_nhwc(x, w, b, 2, 1, True, jnp.float32),
          _ref_conv2d(bf(x), bf(w), b, 2, 1, True), "conv3x3_s2")
    w1 = jax.random.normal(ks[3], (1, 16, 3, 3), jnp.float32) * 0.1
    b1 = jax.random.normal(ks[4], (1,), jnp.float32) * 0.1
    close(conv2d_nhwc(x, w1, b1, 1, 1, False, jnp.float32),
          _ref_conv2d(bf(x), bf(w1), b1, 1, 1, False), "disp_head")
    wd = jax.random.normal(ks[5], (16, 12, 4, 4), jnp.float32) * 0.1
    bd = jax.random.normal(ks[6], (12,), jnp.float32) * 0.1
    close(conv_transpose2d_nhwc(x, wd, bd, True, jnp.float32),
          _ref_deconv(bf(x), bf(wd), bd, True), "deconv4x4_s2")
    # udisp-style deconv (Cin=1, Cout=1): packed GEMM with N=4 -> padded path.
    x1 = jax.random.normal(ks[0], (2, 8, 8, 1), jnp.float32)
    wu = jax.random.normal(ks[7], (1, 1, 4, 4), jnp.float32) * 0.1
    bu = jax.random.normal(ks[2], (1,), jnp.float32) * 0.1
    close(conv_transpose2d_nhwc(x1, wu, bu, False, jnp.float32),
          _ref_deconv(bf(x1), bf(wu), bu, False), "udisp_deconv")


if __name__ == "__main__":
    key = jax.random.PRNGKey(0)
    kp, kc, k1, k2, k3, k4 = jax.random.split(key, 6)

    _self_check(kc)

    params = make_params(kp)

    B, H, W = 2, 16, 16
    # NCHW inputs, matching PyTorch conventions / channel counts.
    conv1a = jax.random.normal(k1, (B, 64, 2 * H, 2 * W), jnp.float32)
    up_1a2a = jax.random.normal(k2, (B, 32, 4 * H, 4 * W), jnp.float32)
    conv2a = jax.random.normal(k3, (B, 128, H, W), jnp.float32)
    corr1d = jax.random.normal(k4, (B, 81, H, W), jnp.float32)  # 81 + 64 = 145

    disps = forward_nchw(params, conv1a, up_1a2a, conv2a, corr1d)
    jax.block_until_ready(disps)

    expected = [(B, 1, 4 * H, 4 * W), (B, 1, 2 * H, 2 * W), (B, 1, H, W),
                (B, 1, H // 2, W // 2), (B, 1, H // 4, W // 4),
                (B, 1, H // 8, W // 8), (B, 1, H // 16, W // 16)]
    for dmap, s in zip(disps, expected):
        assert dmap.shape == s, (dmap.shape, s)
        assert jnp.all(jnp.isfinite(dmap))
    print("KERNEL_OK")
</pallas_src>

<mosaic_0001>
module attributes {stable_mosaic.version = 11 : i64} {
  func.func @_gemm_bias_kernel(%arg0: i32, %arg1: i32, %arg2: i32, %arg3: memref<128x256xbf16, #tpu.memory_space<vmem>>, %arg4: memref<256x32xbf16, #tpu.memory_space<vmem>>, %arg5: memref<1x32xf32, #tpu.memory_space<vmem>>, %arg6: memref<128x32xf32, #tpu.memory_space<vmem>>, %arg7: memref<128x32xf32, #tpu.memory_space<vmem>>) attributes {dimension_semantics = [#tpu.dimension_semantics<parallel>, #tpu.dimension_semantics<parallel>, #tpu.dimension_semantics<arbitrary>], iteration_bounds = array<i64: 1, 1, 1>, scalar_prefetch = 0 : i64, scratch_operands = 1 : i64, tpu.core_type = #tpu.core_type<tc>, window_params = [{transform_indices = @transform_0, window_bounds = array<i64: 128, 256>}, {transform_indices = @transform_1, window_bounds = array<i64: 256, 32>}, {transform_indices = @transform_2, window_bounds = array<i64: 1, 32>}, {transform_indices = @transform_3, window_bounds = array<i64: 128, 32>}]} {
    %c0_i32 = arith.constant 0 : i32
    %0 = arith.cmpi eq, %arg2, %c0_i32 : i32
    %1 = arith.extui %0 : i1 to i32
    %c0_i32_0 = arith.constant 0 : i32
    %2 = arith.cmpi ne, %1, %c0_i32_0 : i32
    scf.if %2 {
      %cst_10 = arith.constant 0.000000e+00 : f32
      %12 = vector.broadcast %cst_10 : f32 to vector<128x32xf32>
      %c0_11 = arith.constant 0 : index
      %c0_12 = arith.constant 0 : index
      %13 = vector.load %arg7[%c0_11, %c0_12] : memref<128x32xf32, #tpu.memory_space<vmem>>, vector<128x32xf32>
      tpu.vector_store %arg7[%c0_11, %c0_12], %12 {strides = array<i32>} : memref<128x32xf32, #tpu.memory_space<vmem>>, vector<128x32xf32>,
    } else {
    }
    %c0 = arith.constant 0 : index
    %c0_1 = arith.constant 0 : index
    %3 = vector.load %arg7[%c0, %c0_1] : memref<128x32xf32, #tpu.memory_space<vmem>>, vector<128x32xf32>
    %c0_2 = arith.constant 0 : index
    %c0_3 = arith.constant 0 : index
    %4 = vector.load %arg3[%c0_2, %c0_3] : memref<128x256xbf16, #tpu.memory_space<vmem>>, vector<128x256xbf16>
    %c0_4 = arith.constant 0 : index
    %c0_5 = arith.constant 0 : index
    %5 = vector.load %arg4[%c0_4, %c0_5] : memref<256x32xbf16, #tpu.memory_space<vmem>>, vector<256x32xbf16>
    %cst = arith.constant dense<0.000000e+00> : vector<128x32xf32>
    %6 = tpu.matmul %4, %5, %cst {dimension_numbers = #tpu.dot_dimension_numbers<[1], [0], [0], [1], [0, 0, 1, 1], [], []>} : vector<128x256xbf16>, vector<256x32xbf16>, vector<128x32xf32> -> vector<128x32xf32>
    %7 = arith.addf %3, %6 : vector<128x32xf32>
    %c0_6 = arith.constant 0 : index
    %c0_7 = arith.constant 0 : index
    %8 = vector.load %arg7[%c0_6, %c0_7] : memref<128x32xf32, #tpu.memory_space<vmem>>, vector<128x32xf32>
    tpu.vector_store %arg7[%c0_6, %c0_7], %7 {strides = array<i32>} : memref<128x32xf32, #tpu.memory_space<vmem>>, vector<128x32xf32>,
    %c0_i32_8 = arith.constant 0 : i32
    %9 = arith.cmpi eq, %arg2, %c0_i32_8 : i32
    %10 = arith.extui %9 : i1 to i32
    %c0_i32_9 = arith.constant 0 : i32
    %11 = arith.cmpi ne, %10, %c0_i32_9 : i32
    scf.if %11 {
      %c0_10 = arith.constant 0 : index
      %c0_11 = arith.constant 0 : index
      %12 = vector.load %arg7[%c0_10, %c0_11] : memref<128x32xf32, #tpu.memory_space<vmem>>, vector<128x32xf32>
      %c0_12 = arith.constant 0 : index
      %c0_13 = arith.constant 0 : index
      %13 = vector.load %arg5[%c0_12, %c0_13] : memref<1x32xf32, #tpu.memory_space<vmem>>, vector<1x32xf32>
      %14 = vector.broadcast %13 : vector<1x32xf32> to vector<128x32xf32>
      %15 = arith.addf %12, %14 : vector<128x32xf32>
      %cst_14 = arith.constant 0.000000e+00 : f32
      %16 = vector.broadcast %cst_14 : f32 to vector<128x32xf32>
      %17 = arith.maximumf %15, %16 : vector<128x32xf32>
      %c0_15 = arith.constant 0 : index
      %c0_16 = arith.constant 0 : index
      %18 = vector.load %arg6[%c0_15, %c0_16] : memref<128x32xf32, #tpu.memory_space<vmem>>, vector<128x32xf32>
      tpu.vector_store %arg6[%c0_15, %c0_16], %17 {strides = array<i32>} : memref<128x32xf32, #tpu.memory_space<vmem>>, vector<128x32xf32>,
    } else {
    }
    return
  }
  func.func @transform_0(%arg0: i32, %arg1: i32, %arg2: i32) -> (i32, i32) {
    %c0_i32 = arith.constant 0 : i32
    return %arg0, %arg2 : i32, i32
  }
  func.func @transform_1(%arg0: i32, %arg1: i32, %arg2: i32) -> (i32, i32) {
    %c0_i32 = arith.constant 0 : i32
    return %arg2, %arg1 : i32, i32
  }
  func.func @transform_2(%arg0: i32, %arg1: i32, %arg2: i32) -> (i32, i32) {
    %c0_i32 = arith.constant 0 : i32
    %c0_i32_0 = arith.constant 0 : i32
    return %c0_i32, %arg1 : i32, i32
  }
  func.func @transform_3(%arg0: i32, %arg1: i32, %arg2: i32) -> (i32, i32) {
    %c0_i32 = arith.constant 0 : i32
    return %arg0, %arg1 : i32, i32
  }
}

</mosaic_0001>

<bundles_post_ra>
// kernel: tpu_custom_call.1
= control target key start
LH: loop header
LB: loop body
LE: loop exit
PB: predicated region body
PF: predicated region fallthrough
CT: control target
= control target key end

     0   :  { %vm18_vm0 = vcmask 261120   ;;  %s941_s1 = inlined_call_operand.vmem [shape: bf16[256,32], index: 1, kind: input, shape index: {}]   ;;  %s942_s0 = inlined_call_operand.vmem [shape: bf16[128,256], index: 0, kind: input, shape index: {}]   ;;  %s943_s2 = inlined_call_operand.vmem [shape: f32[1,32], index: 2, kind: input, shape index: {}]   ;;  %s944_s3 = inlined_call_operand.vmem [shape: f32[128,32], index: 3, kind: output, shape index: {}]  }
   0x1   :  { %v632_v0 = vld [vmem:[%s941_s1 + $0x38] sm:$0xff]  ;;  %v631_v2 = vld [vmem:[%s941_s1 + $0x30] sm:$0xff]  ;;  %v630_v4 = vld [vmem:[%s941_s1 + $0x28] sm:$0xff] }
   0x2   :  { %v640_v1 = vld [vmem:[%s941_s1 + $0x78] sm:$0xff]  ;;  %275 = vmatpush.bf16.msra.mxu0 %v632_v0  ;;  %641 = vmatpush.bf16.msra.mxu2 %v632_v0  ;;  %v639_v3 = vld [vmem:[%s941_s1 + $0x70] sm:$0xff]  ;;  %v638_v5 = vld [vmem:[%s941_s1 + $0x68] sm:$0xff]  ;;  %v659_v0 = vmov 0.0  }
   0x3   :  { %324 = vmatpush.bf16.msra.mxu1 %v640_v1  ;;  %649 = vmatpush.bf16.msra.mxu3 %v640_v1  ;;  %v629_v6 = vld [vmem:[%s941_s1 + $0x20] sm:$0xff]  ;;  %v628_v8 = vld [vmem:[%s941_s1 + $0x18] sm:$0xff]  ;;  %v627_v10 = vld [vmem:[%s941_s1 + $0x10] sm:$0xff]  ;;  %19 = vst.msk [vmem:[#allocation2] sm:$0xff] %vm18_vm0, %v659_v0 }
   0x4   :  { %v637_v7 = vld [vmem:[%s941_s1 + $0x60] sm:$0xff]  ;;  %v636_v9 = vld [vmem:[%s941_s1 + $0x58] sm:$0xff]  ;;  %v635_v11 = vld [vmem:[%s941_s1 + $0x50] sm:$0xff]  ;;  %20 = vst.msk [vmem:[#allocation2 + $0x8] sm:$0xff] %vm18_vm0, %v659_v0 }
   0x5   :  { %v626_v12 = vld [vmem:[%s941_s1 + $0x8] sm:$0xff]  ;;  %v625_v14 = vld [vmem:[%s941_s1] sm:$0xff]  ;;  %v491_v28 = vld [vmem:[%s942_s0 + $0x10] sm:$0xf]  ;;  %21 = vst.msk [vmem:[#allocation2 + $0x10] sm:$0xff] %vm18_vm0, %v659_v0 }
   0x6   :  { %276 = vmatpush.bf16.msra.mxu0 %v631_v2  ;;  %642 = vmatpush.bf16.msra.mxu2 %v631_v2  ;;  %v634_v13 = vld [vmem:[%s941_s1 + $0x48] sm:$0xff]  ;;  %v633_v15 = vld [vmem:[%s941_s1 + $0x40] sm:$0xff]  ;;  %v612_v29 = vld [vmem:[%s942_s0 + $0x14] sm:$0xf0]  ;;  %22 = vst.msk [vmem:[#allocation2 + $0x18] sm:$0xff] %vm18_vm0, %v659_v0 }
   0x7   :  { %325 = vmatpush.bf16.msra.mxu1 %v639_v3  ;;  %650 = vmatpush.bf16.msra.mxu3 %v639_v3  ;;  %v483_v16 = vld [vmem:[%s942_s0] sm:$0xf]  ;;  %v610_v17 = vld [vmem:[%s942_s0 + $0x4] sm:$0xf0]  ;;  %v609_v20 = vld [vmem:[%s942_s0 + $0x4] sm:$0xf]  ;;  %v492_v36 = vor.u32 %v612_v29, %v491_v28 }
   0x8   :  { %v515_v18 = vld [vmem:[%s942_s0 + $0x40] sm:$0xf]  ;;  %v618_v19 = vld [vmem:[%s942_s0 + $0x44] sm:$0xf0]  ;;  %v485_v21 = vld [vmem:[%s942_s0 + $0x8] sm:$0xf0]  ;;  %v484_v24 = vor.u32 %v610_v17, %v483_v16 }
   0x9   :  { %v617_v22 = vld [vmem:[%s942_s0 + $0x44] sm:$0xf]  ;;  %v517_v23 = vld [vmem:[%s942_s0 + $0x48] sm:$0xf0]  ;;  %v516_v25 = vor.u32 %v618_v19, %v515_v18  ;;  %v488_v26 = vor.u32 %v609_v20, %v485_v21  ;;  %v523_v30 = vld [vmem:[%s942_s0 + $0x50] sm:$0xf] }
   0xa   :  { %277 = vmatpush.bf16.msra.mxu0 %v630_v4  ;;  %643 = vmatpush.bf16.msra.mxu2 %v630_v4  ;;  %v520_v27 = vor.u32 %v617_v22, %v517_v23  ;;  %v620_v31 = vld [vmem:[%s942_s0 + $0x54] sm:$0xf0]  ;;  %v611_v32 = vld [vmem:[%s942_s0 + $0x14] sm:$0xf]  ;;  %v493_v33 = vld [vmem:[%s942_s0 + $0x18] sm:$0xf0] }
   0xb   :  { %326 = vmatpush.bf16.msra.mxu1 %v638_v5  ;;  %651 = vmatpush.bf16.msra.mxu3 %v638_v5  ;;  %v619_v34 = vld [vmem:[%s942_s0 + $0x54] sm:$0xf]  ;;  %v525_v35 = vld [vmem:[%s942_s0 + $0x58] sm:$0xf0]  ;;  %v524_v37 = vor.u32 %v620_v31, %v523_v30  ;;  %v496_v38 = vor.u32 %v611_v32, %v493_v33  ;;  %v499_v40 = vld [vmem:[%s942_s0 + $0x20] sm:$0xf] }
   0xc   :  { %v528_v39 = vor.u32 %v619_v34, %v525_v35  ;;  %v614_v41 = vld [vmem:[%s942_s0 + $0x24] sm:$0xf0]  ;;  %v531_v42 = vld [vmem:[%s942_s0 + $0x60] sm:$0xf]  ;;  %v613_v44 = vld [vmem:[%s942_s0 + $0x24] sm:$0xf] }
   0xd   :  { %v622_v43 = vld [vmem:[%s942_s0 + $0x64] sm:$0xf0]  ;;  %v501_v45 = vld [vmem:[%s942_s0 + $0x28] sm:$0xf0]  ;;  %v621_v46 = vld [vmem:[%s942_s0 + $0x64] sm:$0xf]  ;;  %v500_v48 = vor.u32 %v614_v41, %v499_v40 }
   0xe   :  { %278 = vmatpush.bf16.msra.mxu0 %v629_v6  ;;  %644 = vmatpush.bf16.msra.mxu2 %v629_v6  ;;  %v533_v47 = vld [vmem:[%s942_s0 + $0x68] sm:$0xf0]  ;;  %v532_v49 = vor.u32 %v622_v43, %v531_v42  ;;  %v504_v50 = vor.u32 %v613_v44, %v501_v45  ;;  %v507_v52 = vld [vmem:[%s942_s0 + $0x30] sm:$0xf]  ;;  %v616_v53 = vld [vmem:[%s942_s0 + $0x34] sm:$0xf0] }
   0xf   :  { %327 = vmatpush.bf16.msra.mxu1 %v637_v7  ;;  %652 = vmatpush.bf16.msra.mxu3 %v637_v7  ;;  %v536_v51 = vor.u32 %v621_v46, %v533_v47  ;;  %v539_v54 = vld [vmem:[%s942_s0 + $0x70] sm:$0xf]  ;;  %v624_v55 = vld [vmem:[%s942_s0 + $0x74] sm:$0xf0]  ;;  %v615_v56 = vld [vmem:[%s942_s0 + $0x34] sm:$0xf]  ;;  %v508_v60 = vor.u32 %v616_v53, %v507_v52 }
  0x10   :  { %v509_v57 = vld [vmem:[%s942_s0 + $0x38] sm:$0xf0]  ;;  %v623_v58 = vld [vmem:[%s942_s0 + $0x74] sm:$0xf]  ;;  %v540_v61 = vor.u32 %v624_v55, %v539_v54  ;;  %23 = vst.msk [vmem:[#allocation2 + $0x20] sm:$0xff] %vm18_vm0, %v659_v0  ;;  %v35_v2 = vld [vmem:[#allocation2] sm:$0xff] }
  0x11   :  { %v541_v59 = vld [vmem:[%s942_s0 + $0x78] sm:$0xf0]  ;;  %v512_v62 = vor.u32 %v615_v56, %v509_v57  ;;  %24 = vst.msk [vmem:[#allocation2 + $0x28] sm:$0xff] %vm18_vm0, %v659_v0 }
  0x12   :  { %279 = vmatpush.bf16.msra.mxu0 %v628_v8  ;;  %645 = vmatpush.bf16.msra.mxu2 %v628_v8  ;;  %v544_v63 = vor.u32 %v623_v58, %v541_v59  ;;  %25 = vst.msk [vmem:[#allocation2 + $0x30] sm:$0xff] %vm18_vm0, %v659_v0  ;;  %v38_v41 = vld [vmem:[#allocation2 + $0x18] sm:$0xff] }
  0x13   :  { %328 = vmatpush.bf16.msra.mxu1 %v636_v9  ;;  %653 = vmatpush.bf16.msra.mxu3 %v636_v9  ;;  %26 = vst.msk [vmem:[#allocation2 + $0x38] sm:$0xff] %vm18_vm0, %v659_v0 }
  0x14   :  { %27 = vst.msk [vmem:[#allocation2 + $0x40] sm:$0xff] %vm18_vm0, %v659_v0 }
  0x15   :  { %28 = vst.msk [vmem:[#allocation2 + $0x48] sm:$0xff] %vm18_vm0, %v659_v0 }
  0x16   :  { %280 = vmatpush.bf16.msra.mxu0 %v627_v10  ;;  %646 = vmatpush.bf16.msra.mxu2 %v627_v10  ;;  %29 = vst.msk [vmem:[#allocation2 + $0x50] sm:$0xff] %vm18_vm0, %v659_v0 }
  0x17   :  { %329 = vmatpush.bf16.msra.mxu1 %v635_v11  ;;  %654 = vmatpush.bf16.msra.mxu3 %v635_v11  ;;  %30 = vst.msk [vmem:[#allocation2 + $0x58] sm:$0xff] %vm18_vm0, %v659_v0  ;;  %v36_v11 = vld [vmem:[#allocation2 + $0x8] sm:$0xff]  ;;  %v39_v57 = vld [vmem:[#allocation2 + $0x20] sm:$0xff] }
  0x18   :  { %31 = vst.msk [vmem:[#allocation2 + $0x60] sm:$0xff] %vm18_vm0, %v659_v0 }
  0x19   :  { %32 = vst.msk [vmem:[#allocation2 + $0x68] sm:$0xff] %vm18_vm0, %v659_v0 }
  0x1a   :  { %281 = vmatpush.bf16.msra.mxu0 %v626_v12  ;;  %647 = vmatpush.bf16.msra.mxu2 %v626_v12  ;;  %33 = vst.msk [vmem:[#allocation2 + $0x70] sm:$0xff] %vm18_vm0, %v659_v0 }
  0x1b   :  { %330 = vmatpush.bf16.msra.mxu1 %v634_v13  ;;  %655 = vmatpush.bf16.msra.mxu3 %v634_v13  ;;  %34 = vst.msk [vmem:[#allocation2 + $0x78] sm:$0xff] %vm18_vm0, %v659_v0  ;;  %v43_v7 = vld [vmem:[#allocation2 + $0x40] sm:$0xff] }
  0x1c   :  { %v844_v13 = vld [vmem:[%s943_s2] ss:$0 sm:$0xff]  ;;  %v44_v20 = vld [vmem:[#allocation2 + $0x48] sm:$0xff] }
  0x1e   :  { %282 = vmatpush.bf16.msra.mxu0 %v625_v14  ;;  %648 = vmatpush.bf16.msra.mxu2 %v625_v14  ;;  %v46_v52 = vld [vmem:[#allocation2 + $0x58] sm:$0xff] }
  0x1f   :  { %331 = vmatpush.bf16.msra.mxu1 %v633_v15  ;;  %656 = vmatpush.bf16.msra.mxu3 %v633_v15 }
  0x21   :  { %283 = vmatmul.bf16.vlgmr.msra.gmra.mxu0 %v484_v24  ;;  %303 = vmatmul.bf16.vlgmr.msra.gmra.mxu2 %v516_v25  ;;  %v37_v25 = vld [vmem:[#allocation2 + $0x10] sm:$0xff] }
  0x22   :  { %332 = vmatmul.bf16.vlgmr.msra.gmra.mxu1 %v488_v26  ;;  %352 = vmatmul.bf16.vlgmr.msra.gmra.mxu3 %v520_v27 }
  0x31   :  { %288 = vmatmul.bf16.gmra.mxu0 %v492_v36  ;;  %308 = vmatmul.bf16.gmra.mxu2 %v524_v37  ;;  %v45_v36 = vld [vmem:[#allocation2 + $0x50] sm:$0xff] }
  0x32   :  { %337 = vmatmul.bf16.gmra.mxu1 %v496_v38  ;;  %357 = vmatmul.bf16.gmra.mxu3 %v528_v39 }
  0x41   :  { %293 = vmatmul.bf16.gmra.mxu0 %v500_v48  ;;  %313 = vmatmul.bf16.gmra.mxu2 %v532_v49 }
  0x42   :  { %342 = vmatmul.bf16.gmra.mxu1 %v504_v50  ;;  %362 = vmatmul.bf16.gmra.mxu3 %v536_v51 }
  0x51   :  { %298 = vmatmul.bf16.gmra.mxu0 %v508_v60  ;;  %318 = vmatmul.bf16.gmra.mxu2 %v540_v61 }
  0x52   :  { %347 = vmatmul.bf16.gmra.mxu1 %v512_v62  ;;  %367 = vmatmul.bf16.gmra.mxu3 %v544_v63 }
  0x9e   :  { %v284_v1 = vpop.f32.mrf.mxu0 }
  0x9f   :  { %v333_v3 = vpop.f32.mrf.mxu1 }
  0xa0   :  { %v334_v4 = vadd.f32 %v333_v3, %v284_v1 }
  0xa2   :  { %v373_v5 = vadd.f32 %v334_v4, %v35_v2  ;;  %v47_v4 = vld [vmem:[#allocation2 + $0x60] sm:$0xff] }
  0xa4   :  { %390 = vst.msk [vmem:[#allocation2] sm:$0xff] %vm18_vm0, %v373_v5  ;;  %v304_v6 = vpop.f32.mrf.mxu2 }
  0xa5   :  { %v353_v8 = vpop.f32.mrf.mxu3 }
  0xa6   :  { %v354_v9 = vadd.f32 %v353_v8, %v304_v6  ;;  %v286_v10 = vpop.f32.mrf.mxu0 }
  0xa7   :  { %v335_v12 = vpop.f32.mrf.mxu1 }
  0xa8   :  { %v381_v14 = vadd.f32 %v354_v9, %v43_v7  ;;  %v336_v15 = vadd.f32 %v335_v12, %v286_v10  ;;  %v40_v9 = vld [vmem:[#allocation2 + $0x28] sm:$0xff] }
  0xaa   :  { %398 = vst.msk [vmem:[#allocation2 + $0x40] sm:$0xff] %vm18_vm0, %v381_v14  ;;  %v374_v16 = vadd.f32 %v336_v15, %v36_v11 }
  0xab   :  { %v409_v17 = vld [vmem:[#allocation2] sm:$0xff] }
  0xac   :  { %v429_v18 = vadd.f32 %v844_v13, %v409_v17  ;;  %391 = vst.msk [vmem:[#allocation2 + $0x8] sm:$0xff] %vm18_vm0, %v374_v16  ;;  %v306_v19 = vpop.f32.mrf.mxu2 }
  0xad   :  { %v355_v21 = vpop.f32.mrf.mxu3 }
  0xae   :  { %v445_v22 = vmax.f32 %v429_v18, 0.0  ;;  %v356_v23 = vadd.f32 %v355_v21, %v306_v19  ;;  %v289_v24 = vpop.f32.mrf.mxu0  ;;  %v48_v21 = vld [vmem:[#allocation2 + $0x68] sm:$0xff] }
  0xaf   :  { %v338_v26 = vpop.f32.mrf.mxu1 }
  0xb0   :  { %461 = vst.msk [vmem:[%s944_s3] sm:$0xff] %vm18_vm0, %v445_v22  ;;  %v382_v27 = vadd.f32 %v356_v23, %v44_v20  ;;  %v339_v28 = vadd.f32 %v338_v26, %v289_v24  ;;  %v41_v26 = vld [vmem:[#allocation2 + $0x30] sm:$0xff] }
  0xb1   :  { %v417_v29 = vld [vmem:[#allocation2 + $0x40] sm:$0xff] }
  0xb2   :  { %v437_v30 = vadd.f32 %v844_v13, %v417_v29  ;;  %399 = vst.msk [vmem:[#allocation2 + $0x48] sm:$0xff] %vm18_vm0, %v382_v27  ;;  %v375_v31 = vadd.f32 %v339_v28, %v37_v25 }
  0xb3   :  { %v410_v32 = vld [vmem:[#allocation2 + $0x8] sm:$0xff] }
  0xb4   :  { %v453_v33 = vmax.f32 %v437_v30, 0.0  ;;  %v430_v34 = vadd.f32 %v844_v13, %v410_v32  ;;  %392 = vst.msk [vmem:[#allocation2 + $0x10] sm:$0xff] %vm18_vm0, %v375_v31  ;;  %v309_v35 = vpop.f32.mrf.mxu2 }
  0xb5   :  { %v358_v37 = vpop.f32.mrf.mxu3 }
  0xb6   :  { %469 = vst.msk [vmem:[%s944_s3 + $0x40] sm:$0xff] %vm18_vm0, %v453_v33  ;;  %v446_v38 = vmax.f32 %v430_v34, 0.0  ;;  %v359_v39 = vadd.f32 %v358_v37, %v309_v35  ;;  %v291_v40 = vpop.f32.mrf.mxu0  ;;  %v49_v37 = vld [vmem:[#allocation2 + $0x70] sm:$0xff] }
  0xb7   :  { %v340_v42 = vpop.f32.mrf.mxu1 }
  0xb8   :  { %462 = vst.msk [vmem:[%s944_s3 + $0x8] sm:$0xff] %vm18_vm0, %v446_v38  ;;  %v383_v43 = vadd.f32 %v359_v39, %v45_v36  ;;  %v341_v44 = vadd.f32 %v340_v42, %v291_v40  ;;  %v42_v42 = vld [vmem:[#allocation2 + $0x38] sm:$0xff] }
  0xb9   :  { %v418_v45 = vld [vmem:[#allocation2 + $0x48] sm:$0xff] }
  0xba   :  { %v438_v46 = vadd.f32 %v844_v13, %v418_v45  ;;  %400 = vst.msk [vmem:[#allocation2 + $0x50] sm:$0xff] %vm18_vm0, %v383_v43  ;;  %v376_v47 = vadd.f32 %v341_v44, %v38_v41 }
  0xbb   :  { %v411_v48 = vld [vmem:[#allocation2 + $0x10] sm:$0xff] }
  0xbc   :  { %v454_v49 = vmax.f32 %v438_v46, 0.0  ;;  %v431_v50 = vadd.f32 %v844_v13, %v411_v48  ;;  %393 = vst.msk [vmem:[#allocation2 + $0x18] sm:$0xff] %vm18_vm0, %v376_v47  ;;  %v311_v51 = vpop.f32.mrf.mxu2 }
  0xbd   :  { %v360_v53 = vpop.f32.mrf.mxu3 }
  0xbe   :  { %470 = vst.msk [vmem:[%s944_s3 + $0x48] sm:$0xff] %vm18_vm0, %v454_v49  ;;  %v447_v54 = vmax.f32 %v431_v50, 0.0  ;;  %v361_v55 = vadd.f32 %v360_v53, %v311_v51  ;;  %v294_v56 = vpop.f32.mrf.mxu0  ;;  %v50_v53 = vld [vmem:[#allocation2 + $0x78] sm:$0xff] }
  0xbf   :  { %v343_v58 = vpop.f32.mrf.mxu1 }
  0xc0   :  { %463 = vst.msk [vmem:[%s944_s3 + $0x10] sm:$0xff] %vm18_vm0, %v447_v54  ;;  %v384_v59 = vadd.f32 %v361_v55, %v46_v52  ;;  %v344_v60 = vadd.f32 %v343_v58, %v294_v56 }
  0xc1   :  { %v419_v61 = vld [vmem:[#allocation2 + $0x50] sm:$0xff] }
  0xc2   :  { %v439_v62 = vadd.f32 %v844_v13, %v419_v61  ;;  %401 = vst.msk [vmem:[#allocation2 + $0x58] sm:$0xff] %vm18_vm0, %v384_v59  ;;  %v377_v63 = vadd.f32 %v344_v60, %v39_v57 }
  0xc3   :  { %v412_v0 = vld [vmem:[#allocation2 + $0x18] sm:$0xff] }
  0xc4   :  { %v455_v1 = vmax.f32 %v439_v62, 0.0  ;;  %v432_v2 = vadd.f32 %v844_v13, %v412_v0  ;;  %394 = vst.msk [vmem:[#allocation2 + $0x20] sm:$0xff] %vm18_vm0, %v377_v63  ;;  %v314_v3 = vpop.f32.mrf.mxu2 }
  0xc5   :  { %v363_v5 = vpop.f32.mrf.mxu3 }
  0xc6   :  { %471 = vst.msk [vmem:[%s944_s3 + $0x50] sm:$0xff] %vm18_vm0, %v455_v1  ;;  %v448_v6 = vmax.f32 %v432_v2, 0.0  ;;  %v364_v7 = vadd.f32 %v363_v5, %v314_v3  ;;  %v296_v8 = vpop.f32.mrf.mxu0 }
  0xc7   :  { %v345_v10 = vpop.f32.mrf.mxu1 }
  0xc8   :  { %464 = vst.msk [vmem:[%s944_s3 + $0x18] sm:$0xff] %vm18_vm0, %v448_v6  ;;  %v385_v11 = vadd.f32 %v364_v7, %v47_v4  ;;  %v346_v12 = vadd.f32 %v345_v10, %v296_v8 }
  0xc9   :  { %v420_v14 = vld [vmem:[#allocation2 + $0x58] sm:$0xff] }
  0xca   :  { %v440_v15 = vadd.f32 %v844_v13, %v420_v14  ;;  %402 = vst.msk [vmem:[#allocation2 + $0x60] sm:$0xff] %vm18_vm0, %v385_v11  ;;  %v378_v16 = vadd.f32 %v346_v12, %v40_v9 }
  0xcb   :  { %v413_v17 = vld [vmem:[#allocation2 + $0x20] sm:$0xff] }
  0xcc   :  { %v456_v18 = vmax.f32 %v440_v15, 0.0  ;;  %v433_v19 = vadd.f32 %v844_v13, %v413_v17  ;;  %395 = vst.msk [vmem:[#allocation2 + $0x28] sm:$0xff] %vm18_vm0, %v378_v16  ;;  %v316_v20 = vpop.f32.mrf.mxu2 }
  0xcd   :  { %v365_v22 = vpop.f32.mrf.mxu3 }
  0xce   :  { %472 = vst.msk [vmem:[%s944_s3 + $0x58] sm:$0xff] %vm18_vm0, %v456_v18  ;;  %v449_v23 = vmax.f32 %v433_v19, 0.0  ;;  %v366_v24 = vadd.f32 %v365_v22, %v316_v20  ;;  %v299_v25 = vpop.f32.mrf.mxu0 }
  0xcf   :  { %v348_v27 = vpop.f32.mrf.mxu1 }
  0xd0   :  { %465 = vst.msk [vmem:[%s944_s3 + $0x20] sm:$0xff] %vm18_vm0, %v449_v23  ;;  %v386_v28 = vadd.f32 %v366_v24, %v48_v21  ;;  %v349_v29 = vadd.f32 %v348_v27, %v299_v25 }
  0xd1   :  { %v421_v30 = vld [vmem:[#allocation2 + $0x60] sm:$0xff] }
  0xd2   :  { %v441_v31 = vadd.f32 %v844_v13, %v421_v30  ;;  %403 = vst.msk [vmem:[#allocation2 + $0x68] sm:$0xff] %vm18_vm0, %v386_v28  ;;  %v379_v32 = vadd.f32 %v349_v29, %v41_v26 }
  0xd3   :  { %v414_v33 = vld [vmem:[#allocation2 + $0x28] sm:$0xff] }
  0xd4   :  { %v457_v34 = vmax.f32 %v441_v31, 0.0  ;;  %v434_v35 = vadd.f32 %v844_v13, %v414_v33  ;;  %396 = vst.msk [vmem:[#allocation2 + $0x30] sm:$0xff] %vm18_vm0, %v379_v32  ;;  %v319_v36 = vpop.f32.mrf.mxu2 }
  0xd5   :  { %v368_v38 = vpop.f32.mrf.mxu3 }
  0xd6   :  { %473 = vst.msk [vmem:[%s944_s3 + $0x60] sm:$0xff] %vm18_vm0, %v457_v34  ;;  %v450_v39 = vmax.f32 %v434_v35, 0.0  ;;  %v369_v40 = vadd.f32 %v368_v38, %v319_v36  ;;  %v301_v41 = vpop.f32.mrf.mxu0 }
  0xd7   :  { %v350_v43 = vpop.f32.mrf.mxu1 }
  0xd8   :  { %466 = vst.msk [vmem:[%s944_s3 + $0x28] sm:$0xff] %vm18_vm0, %v450_v39  ;;  %v387_v44 = vadd.f32 %v369_v40, %v49_v37  ;;  %v351_v45 = vadd.f32 %v350_v43, %v301_v41 }
  0xd9   :  { %v422_v46 = vld [vmem:[#allocation2 + $0x68] sm:$0xff] }
  0xda   :  { %v442_v47 = vadd.f32 %v844_v13, %v422_v46  ;;  %404 = vst.msk [vmem:[#allocation2 + $0x70] sm:$0xff] %vm18_vm0, %v387_v44  ;;  %v380_v48 = vadd.f32 %v351_v45, %v42_v42 }
  0xdb   :  { %v415_v49 = vld [vmem:[#allocation2 + $0x30] sm:$0xff] }
  0xdc   :  { %v458_v50 = vmax.f32 %v442_v47, 0.0  ;;  %v435_v51 = vadd.f32 %v844_v13, %v415_v49  ;;  %397 = vst.msk [vmem:[#allocation2 + $0x38] sm:$0xff] %vm18_vm0, %v380_v48  ;;  %v321_v52 = vpop.f32.mrf.mxu2 }
  0xdd   :  { %v370_v54 = vpop.f32.mrf.mxu3 }
  0xde   :  { %474 = vst.msk [vmem:[%s944_s3 + $0x68] sm:$0xff] %vm18_vm0, %v458_v50  ;;  %v451_v55 = vmax.f32 %v435_v51, 0.0  ;;  %v371_v56 = vadd.f32 %v370_v54, %v321_v52 }
  0xe0   :  { %467 = vst.msk [vmem:[%s944_s3 + $0x30] sm:$0xff] %vm18_vm0, %v451_v55  ;;  %v388_v57 = vadd.f32 %v371_v56, %v50_v53 }
  0xe1   :  { %v423_v58 = vld [vmem:[#allocation2 + $0x70] sm:$0xff] }
  0xe2   :  { %v443_v59 = vadd.f32 %v844_v13, %v423_v58  ;;  %405 = vst.msk [vmem:[#allocation2 + $0x78] sm:$0xff] %vm18_vm0, %v388_v57 }
  0xe3   :  { %v416_v60 = vld [vmem:[#allocation2 + $0x38] sm:$0xff] }
  0xe4   :  { %v459_v61 = vmax.f32 %v443_v59, 0.0  ;;  %v436_v62 = vadd.f32 %v844_v13, %v416_v60 }
  0xe6   :  { %475 = vst.msk [vmem:[%s944_s3 + $0x70] sm:$0xff] %vm18_vm0, %v459_v61  ;;  %v452_v63 = vmax.f32 %v436_v62, 0.0 }
  0xe8   :  { %468 = vst.msk [vmem:[%s944_s3 + $0x38] sm:$0xff] %vm18_vm0, %v452_v63 }
  0xe9   :  { %v424_v0 = vld [vmem:[#allocation2 + $0x78] sm:$0xff] }
  0xea   :  { %v444_v1 = vadd.f32 %v844_v13, %v424_v0 }
  0xec   :  { %v460_v2 = vmax.f32 %v444_v1, 0.0 }
  0xee   :  { %476 = vst.msk [vmem:[%s944_s3 + $0x78] sm:$0xff] %vm18_vm0, %v460_v2 }

</bundles_post_ra>
